<compile_context>
chip_gen: v5e
topology: v5e:2x2
jax: 0.10.0
libtpu: 0.0.40
codegen_flags: <defaults>
</compile_context>

<pallas_src>
import jax
import jax.numpy as jnp
from jax.experimental import pallas as pl
from jax.experimental.pallas import tpu as pltpu

EPS = 1e-5


def conv1x1_bn_kernel(x_ref, w_ref, gamma_ref, beta_ref, o_ref):
    # x_ref:     [R, CinP]     (R = N*Ho*Wo flattened output pixels, resident across grid)
    # w_ref:     [CinP, TN]    (one Cout tile of the weight)
    # gamma_ref: [1, TN]
    # beta_ref:  [1, TN]
    # o_ref:     [R, TN]
    x = x_ref[...]
    w = w_ref[...]

    # 1x1 conv (stride applied by the strided gather outside) == matmul on the MXU.
    y = jnp.dot(x, w, preferred_element_type=jnp.float32)        # [R, TN] f32

    # BatchNorm2d (training mode): biased batch statistics per output channel.
    r = y.shape[0]
    inv_r = 1.0 / r
    mean = jnp.sum(y, axis=0, keepdims=True) * inv_r              # [1, TN]
    d = y - mean
    var = jnp.sum(d * d, axis=0, keepdims=True) * inv_r           # [1, TN]
    inv = jax.lax.rsqrt(var + EPS)                                # [1, TN]

    o_ref[...] = (d * (inv * gamma_ref[...]) + beta_ref[...]).astype(o_ref.dtype)


def conv1x1_stride2_bn(x_nchw, weight, gamma, beta, *, tn=256):
    """x_nchw: [N, Cin, H, W]; weight: [Cout, Cin, 1, 1]; gamma/beta: [Cout]."""
    n, cin, h, w = x_nchw.shape
    cout = weight.shape[0]
    stride = 2
    ho = (h - 1) // stride + 1
    wo = (w - 1) // stride + 1
    r = n * ho * wo

    # Pad channel dims to lane multiples (128). Zero padding does not change the matmul.
    cin_p = pl.cdiv(cin, 128) * 128     # 408 -> 512
    cout_p = pl.cdiv(cout, 128) * 128   # 912 -> 1024
    tn = min(tn, cout_p)
    assert cout_p % tn == 0

    # Glue (plain JAX, tiny tensors; XLA fuses these): strided subsample + layout [R, CinP].
    x_s = x_nchw[:, :, ::stride, ::stride]                              # [N, Cin, Ho, Wo]
    x2d = jnp.transpose(x_s, (0, 2, 3, 1)).reshape(r, cin)              # [R, Cin]
    x2d = jnp.pad(x2d, ((0, 0), (0, cin_p - cin)))                      # [R, CinP]

    w2d = jnp.transpose(weight.reshape(cout, cin), (1, 0))              # [Cin, Cout]
    w2d = jnp.pad(w2d, ((0, cin_p - cin), (0, cout_p - cout)))          # [CinP, CoutP]

    gamma2d = jnp.pad(gamma.reshape(1, cout), ((0, 0), (0, cout_p - cout)))  # [1, CoutP]
    beta2d = jnp.pad(beta.reshape(1, cout), ((0, 0), (0, cout_p - cout)))    # [1, CoutP]

    out2d = pl.pallas_call(
        conv1x1_bn_kernel,
        out_shape=jax.ShapeDtypeStruct((r, cout_p), jnp.float32),
        grid=(cout_p // tn,),
        in_specs=[
            pl.BlockSpec((r, cin_p), lambda j: (0, 0)),   # x resident across the grid
            pl.BlockSpec((cin_p, tn), lambda j: (0, j)),  # weight tiles: pipelined DMA
            pl.BlockSpec((1, tn), lambda j: (0, j)),
            pl.BlockSpec((1, tn), lambda j: (0, j)),
        ],
        out_specs=pl.BlockSpec((r, tn), lambda j: (0, j)),
        compiler_params=pltpu.CompilerParams(
            dimension_semantics=("parallel",)),           # Cout tiles independent -> megacore
    )(x2d, w2d, gamma2d, beta2d)

    # Drop padded channels and go back to NCHW.
    out = out2d[:, :cout].reshape(n, ho, wo, cout)
    return jnp.transpose(out, (0, 3, 1, 2))               # [N, Cout, Ho, Wo]


def reference(x_nchw, weight, gamma, beta):
    """Pure-JAX reference of the same forward pass (training-mode BN)."""
    n, cin, h, w = x_nchw.shape
    cout = weight.shape[0]
    x_s = x_nchw[:, :, ::2, ::2]
    x2d = jnp.transpose(x_s, (0, 2, 3, 1)).reshape(-1, cin)
    y = jnp.dot(x2d, weight.reshape(cout, cin).T,
                precision=jax.lax.Precision.HIGHEST)
    mean = jnp.mean(y, axis=0, keepdims=True)
    var = jnp.mean((y - mean) ** 2, axis=0, keepdims=True)
    out = (y - mean) * jax.lax.rsqrt(var + EPS) * gamma[None, :] + beta[None, :]
    ho, wo = x_s.shape[2], x_s.shape[3]
    return jnp.transpose(out.reshape(n, ho, wo, cout), (0, 3, 1, 2))


if __name__ == "__main__":
    key = jax.random.PRNGKey(0)
    k_x, k_w = jax.random.split(key)

    N, CIN, H, W = 1, 408, 14, 14
    COUT = 912

    x = jax.random.normal(k_x, (N, CIN, H, W), dtype=jnp.float32)
    # Deterministic synthetic conv weight (kaiming-ish scale), no bias.
    weight = jax.random.normal(k_w, (COUT, CIN, 1, 1), dtype=jnp.float32) * (1.0 / (CIN ** 0.5))
    # BatchNorm2d default init: gamma = 1, beta = 0.
    gamma = jnp.ones((COUT,), dtype=jnp.float32)
    beta = jnp.zeros((COUT,), dtype=jnp.float32)

    out = conv1x1_stride2_bn(x, weight, gamma, beta)
    out = jax.block_until_ready(out)

    ref = jax.block_until_ready(reference(x, weight, gamma, beta))
    assert out.shape == (N, COUT, 7, 7), out.shape
    assert jnp.allclose(out, ref, atol=5e-3, rtol=5e-3), "mismatch vs reference"

    print("KERNEL_OK")
</pallas_src>

<mosaic_0001>
module attributes {stable_mosaic.version = 11 : i64} {
  func.func @conv1x1_bn_kernel(%arg0: i32, %arg1: memref<49x512xf32, #tpu.memory_space<vmem>>, %arg2: memref<512x256xf32, #tpu.memory_space<vmem>>, %arg3: memref<1x256xf32, #tpu.memory_space<vmem>>, %arg4: memref<1x256xf32, #tpu.memory_space<vmem>>, %arg5: memref<49x256xf32, #tpu.memory_space<vmem>>) attributes {dimension_semantics = [#tpu.dimension_semantics<parallel>], iteration_bounds = array<i64: 4>, scalar_prefetch = 0 : i64, scratch_operands = 0 : i64, tpu.core_type = #tpu.core_type<tc>, window_params = [{pipeline_mode = #tpu.pipeline_mode<synchronous>, transform_indices = @transform_0, window_bounds = array<i64: 49, 512>}, {transform_indices = @transform_1, window_bounds = array<i64: 512, 256>}, {transform_indices = @transform_2, window_bounds = array<i64: 1, 256>}, {transform_indices = @transform_3, window_bounds = array<i64: 1, 256>}, {transform_indices = @transform_4, window_bounds = array<i64: 49, 256>}]} {
    %c0 = arith.constant 0 : index
    %c0_0 = arith.constant 0 : index
    %0 = vector.load %arg1[%c0, %c0_0] : memref<49x512xf32, #tpu.memory_space<vmem>>, vector<49x512xf32>
    %c0_1 = arith.constant 0 : index
    %c0_2 = arith.constant 0 : index
    %1 = vector.load %arg2[%c0_1, %c0_2] : memref<512x256xf32, #tpu.memory_space<vmem>>, vector<512x256xf32>
    %cst = arith.constant dense<0.000000e+00> : vector<49x256xf32>
    %2 = tpu.matmul %0, %1, %cst {dimension_numbers = #tpu.dot_dimension_numbers<[1], [0], [0], [1], [0, 0, 1, 1], [], []>} : vector<49x512xf32>, vector<512x256xf32>, vector<49x256xf32> -> vector<49x256xf32>
    %cst_3 = arith.constant dense<0.000000e+00> : vector<256xf32>
    %3 = vector.multi_reduction <add>, %2, %cst_3 [0] : vector<49x256xf32> to vector<256xf32>
    %4 = vector.shape_cast %3 : vector<256xf32> to vector<1x256xf32>
    %cst_4 = arith.constant 0.0204081628 : f32
    %5 = vector.broadcast %cst_4 : f32 to vector<1x256xf32>
    %6 = arith.mulf %4, %5 : vector<1x256xf32>
    %7 = vector.broadcast %6 : vector<1x256xf32> to vector<49x256xf32>
    %8 = arith.subf %2, %7 : vector<49x256xf32>
    %9 = arith.mulf %8, %8 : vector<49x256xf32>
    %cst_5 = arith.constant dense<0.000000e+00> : vector<256xf32>
    %10 = vector.multi_reduction <add>, %9, %cst_5 [0] : vector<49x256xf32> to vector<256xf32>
    %11 = vector.shape_cast %10 : vector<256xf32> to vector<1x256xf32>
    %cst_6 = arith.constant 0.0204081628 : f32
    %12 = vector.broadcast %cst_6 : f32 to vector<1x256xf32>
    %13 = arith.mulf %11, %12 : vector<1x256xf32>
    %cst_7 = arith.constant 9.99999974E-6 : f32
    %14 = vector.broadcast %cst_7 : f32 to vector<1x256xf32>
    %15 = arith.addf %13, %14 : vector<1x256xf32>
    %16 = math.rsqrt %15 : vector<1x256xf32>
    %c0_8 = arith.constant 0 : index
    %c0_9 = arith.constant 0 : index
    %17 = vector.load %arg3[%c0_8, %c0_9] : memref<1x256xf32, #tpu.memory_space<vmem>>, vector<1x256xf32>
    %18 = arith.mulf %16, %17 : vector<1x256xf32>
    %19 = vector.broadcast %18 : vector<1x256xf32> to vector<49x256xf32>
    %20 = arith.mulf %8, %19 : vector<49x256xf32>
    %c0_10 = arith.constant 0 : index
    %c0_11 = arith.constant 0 : index
    %21 = vector.load %arg4[%c0_10, %c0_11] : memref<1x256xf32, #tpu.memory_space<vmem>>, vector<1x256xf32>
    %22 = vector.broadcast %21 : vector<1x256xf32> to vector<49x256xf32>
    %23 = arith.addf %20, %22 : vector<49x256xf32>
    %c0_12 = arith.constant 0 : index
    %c0_13 = arith.constant 0 : index
    %24 = vector.load %arg5[%c0_12, %c0_13] : memref<49x256xf32, #tpu.memory_space<vmem>>, vector<49x256xf32>
    tpu.vector_store %arg5[%c0_12, %c0_13], %23 {strides = array<i32>} : memref<49x256xf32, #tpu.memory_space<vmem>>, vector<49x256xf32>,
    return
  }
  func.func @transform_0(%arg0: i32) -> (i32, i32) {
    %c0_i32 = arith.constant 0 : i32
    %c0_i32_0 = arith.constant 0 : i32
    %c0_i32_1 = arith.constant 0 : i32
    return %c0_i32, %c0_i32_0 : i32, i32
  }
  func.func @transform_1(%arg0: i32) -> (i32, i32) {
    %c0_i32 = arith.constant 0 : i32
    %c0_i32_0 = arith.constant 0 : i32
    return %c0_i32, %arg0 : i32, i32
  }
  func.func @transform_2(%arg0: i32) -> (i32, i32) {
    %c0_i32 = arith.constant 0 : i32
    %c0_i32_0 = arith.constant 0 : i32
    return %c0_i32, %arg0 : i32, i32
  }
  func.func @transform_3(%arg0: i32) -> (i32, i32) {
    %c0_i32 = arith.constant 0 : i32
    %c0_i32_0 = arith.constant 0 : i32
    return %c0_i32, %arg0 : i32, i32
  }
  func.func @transform_4(%arg0: i32) -> (i32, i32) {
    %c0_i32 = arith.constant 0 : i32
    %c0_i32_0 = arith.constant 0 : i32
    return %c0_i32, %arg0 : i32, i32
  }
}

</mosaic_0001>

<bundles_post_ra>
// kernel: tpu_custom_call.1
= control target key start
LH: loop header
LB: loop body
LE: loop exit
PB: predicated region body
PF: predicated region fallthrough
CT: control target
= control target key end

     0   :  { %s1901_s0 = inlined_call_operand.hbm [shape: f32[49,512], index: 0, kind: input, shape index: {}]   ;;  %s1902_s1 = inlined_call_operand.hbm [shape: f32[512,1024], index: 1, kind: input, shape index: {}]   ;;  %s1903_s2 = inlined_call_operand.hbm [shape: f32[1,1024], index: 2, kind: input, shape index: {}]   ;;  %s1904_s3 = inlined_call_operand.hbm [shape: f32[1,1024], index: 3, kind: input, shape index: {}]   ;;  %s1905_s4 = inlined_call_operand.hbm [shape: f32[49,1024], index: 4, kind: output, shape index: {}]  }
   0x1   :  { %1909 = sst [smem:[#allocation18_spill]] %s1901_s0 }
   0x2   :  { %1910 = sst [smem:[#allocation19_spill]] %s1902_s1 }
   0x3   :  { %9 = vsyncpa [#allocation3], 0 }
   0x4   :  { %10 = vsyncpa [#allocation6], 0 }
   0x5   :  { %12 = vsyncpa [#allocation6 + $0x1], 0 }
   0x6   :  { %13 = vsyncpa [#allocation9], 0 }
   0x7   :  { %15 = vsyncpa [#allocation9 + $0x1], 0 }
   0x8   :  { %16 = vsyncpa [#allocation4], 0 }
   0x9   :  { %18 = vsyncpa [#allocation4 + $0x1], 0  ;;  %s1415_s15 = smov 0   ;;  %s1417_s16 = smov 0  }
   0xa   :  { %s1419_s17 = smov 0   ;;  %s1421_s18 = smov 0  }
   0xb LB: > { %1911 = sst [smem:[#allocation15_spill]] %s1375_s17  ;;  %s1436_s19 = sadd.s32 1, %s1379_s18   ;;  %s1379_s18 = sphi %s1421_s18, %s1921_s18   ;;  %s1375_s17 = sphi %s1419_s17, %s1923_s17   ;;  %s1371_s16 = sphi %s1417_s16, %s1925_s16   ;;  %s1367_s15 = sphi %s1415_s15, %s1924_s15  }
   0xc   : > { %1912 = sst [smem:[#allocation16_spill]] %s1436_s19  ;;  %s52_s20 = sadd.s32 1, %s1375_s17 }
   0xd   : > { %s49_s21 = ssub.s32 %s1379_s18, %s1436_s19  ;;  %p59_p0 = scmp.ne.s32.totalorder %s1375_s17, %s1371_s16 }
   0xe   : > { %p50_p1 = scmp.eq.s32.totalorder %s49_s21, 0  ;;  %p60_p2 = scmp.eq.s32.totalorder %s1379_s18, 0 }
   0xf   : > { %p1137_p3 = scmp.lt.s32.totalorder %s1379_s18, 4  ;;  %s181_s23 = sand.u32 1, %s1379_s18  }
  0x10   : > { %s1446_s22 = scalar_select %p50_p1, %s1375_s17, %s52_s20  }
  0x11   : > { %p61_p4 = por %p60_p2, %p59_p0  ;;  %s1453_s24 = sand.u32 1, %s1375_s17  }
  0x12   : > { %1913 = sst [smem:[#allocation17_spill]] %s1446_s22  ;;  %s1087_s25 = sshll.u32 %s1453_s24, 10 }
  0x13   : > { %s1103_s26 = sshll.u32 %s1379_s18, 4  ;;  %s1914_s1 = sld [smem:[#allocation19_spill]] }
  0x14   : > { %s185_s5 = scalar_lea.vmem [#allocation5], %s1087_s25  ;;  %p1462_p5 = pnand %p1137_p3, %p61_p4 }
  0x15   : > { %s193_s6 = sshll.u32 %s185_s5, 4  ;;  %s1466_s8 = scalar_lea.sflag [#allocation6], %s181_s23  ;;  %s194_s6 = int_to_ptr.vmem [resolvable:$true] %s193_s6 }
  0x16   : > { %p1189_p7 = pneg %p1462_p5 }
  0x19   : > { %s190_s29 = scalar_lea.hbm %s1914_s1, %s1103_s26  ;;  %s1192_s13 = scalar_lea.hbm %s1914_s1, 4096 }
  0x1a   : > { %s191_s30 = sshll.u32 %s190_s29, 4  ;;  %s192_s30 = int_to_ptr.hbm [resolvable:$true] %s191_s30 }
  0x1b   : > { %s1185_s9 = sshra.s32 %s192_s30, 4  ;;  %s1186_s9 = int_to_ptr.hbm [resolvable:$true] %s1185_s9 }
  0x1c   : > { %s1187_s10 = scalar_lea.hbm %s1186_s9, 1024  ;;  %p1193_p10 = scmp.lt.s32.totalorder %s1186_s9, %s1914_s1 }
  0x1d   : > { %p1188_p6 = scmp.ne.s32.totalorder %s1186_s9, %s1187_s10  ;;  %p1194_p11 = scmp.lt.s32.totalorder %s1192_s13, %s1187_s10 }
  0x1f   : > { %p1190_p8 = pnand %p1189_p7, %p1188_p6  ;;  %p1195_p12 = por %p1194_p11, %p1193_p10 }
  0x21   : > { %p1191_p9 = pneg %p1190_p8 }
  0x23   : > { %p1196_p13 = pnand %p1195_p12, %p1191_p9 }
  0x25   : > { %1199 = shalt.err (!%p1196_p13)
}
  0x26   : > { %s1381_s21 = smov 1024   ;;  %s1382_s23 = smov 256  }
  0x27   : > { %s1383_s25 = smov 16   ;;  %s1483_s26 = sadd.s32 4294967295, %s1379_s18  }
  0x28   : > { %1125 = dma.hbm_to_vmem [thread:$0]  (!%p1462_p5), %s192_s30, 16384, %s194_s6, %s1466_s8, %s1381_s21, %s1382_s23, %s1383_s25  }
  0x29   : > { %s1083_s27 = sadd.s32 4294967294, %s1379_s18   ;;  %p65_p1 = scmp.ne.s32.totalorder %s1371_s16, %s1367_s15 }
  0x2a   : > { %p66_p2 = scmp.eq.s32.totalorder %s1483_s26, 0  ;;  %p141_p3 = scmp.eq.s32.totalorder %s1483_s26, 3 }
  0x2b   : > { %p147_p4 = scmp.eq.s32.totalorder %s1083_s27, 3  ;;  %p1084_p6 = scmp.ge.s32.totalorder %s1379_s18, 1 }
  0x2c   : > { %p1493_p8 = por %p66_p2, %p65_p1  ;;  %p1500_p9 = por %p141_p3, %p59_p0 }
  0x2d   : > { %p1504_p10 = por %p147_p4, %p65_p1  ;;  %p154_p11 = scmp.lt.s32.totalorder %s1379_s18, 5 }
  0x2e   : > { %s1919_s0 = sld [smem:[#allocation18_spill]]  ;;  %s1384_s11 = smov [#allocation2]  }
  0x2f   : > { %p1512_p12 = pnand %p1084_p6, %p154_p11  ;;  %s167_s12 = sshll.u32 %s1384_s11, 4  ;;  %s168_s12 = int_to_ptr.vmem [resolvable:$true] %s167_s12 }
  0x30   : > { %s1090_s13 = sshll.u32 %s1453_s24, 1  ;;  %s1091_s14 = sshll.u32 %s1379_s18, 1 }
  0x31   : > { %p1118_p0 = pneg %p1512_p12  ;;  %s211_s23 = scalar_lea.hbm %s1903_s2, %s1091_s14 }
  0x32   : > { %s1385_s25 = smov 512   ;;  %s1386_s27 = smov 32  }
  0x33   : > { %p1119_p13 = pnand %p1118_p0, %p66_p2  ;;  %s213_s5 = sshll.u32 %s211_s23, 4  ;;  %s214_s5 = int_to_ptr.hbm [resolvable:$true] %s213_s5 }
  0x34   : > { %s165_s9 = sshll.u32 %s1919_s0, 4  ;;  %s207_s6 = scalar_lea.vmem [#allocation7], %s1090_s13  ;;  %s166_s9 = int_to_ptr.hbm [resolvable:$true] %s165_s9 }
  0x35   : > { %1121 = dma.hbm_to_vmem [thread:$0]  (!%p1119_p13), %s166_s9, 3584, %s168_s12, [#allocation3], %s1385_s25, %s1385_s25, %s1386_s27  }
  0x36   : > { %s215_s0 = sshll.u32 %s207_s6, 4  ;;  %s1245_s1 = sshra.s32 %s214_s5, 4  ;;  %s216_s0 = int_to_ptr.vmem [resolvable:$true] %s215_s0  ;;  %s1246_s1 = int_to_ptr.hbm [resolvable:$true] %s1245_s1 }
  0x37   : > { %s1247_s11 = scalar_lea.hbm %s1246_s1, 2  ;;  %s1252_s20 = scalar_lea.hbm %s1903_s2, 8 }
  0x38   : > { %p1248_p1 = scmp.ne.s32.totalorder %s1246_s1, %s1247_s11  ;;  %p1253_p6 = scmp.lt.s32.totalorder %s1246_s1, %s1903_s2 }
  0x39   : > { %p1254_p11 = scmp.lt.s32.totalorder %s1252_s20, %s1247_s11 }
  0x3a   : > { %p1250_p3 = pnand %p1248_p1, %p1189_p7 }
  0x3b   : > { %p1255_p0 = por %p1254_p11, %p1253_p6 }
  0x3c   : > { %p1251_p4 = pneg %p1250_p3 }
  0x3e   : > { %p1256_p13 = pnand %p1255_p0, %p1251_p4 }
  0x40   : > { %1259 = shalt.err (!%p1256_p13)
}
  0x41   : > { %1128 = dma.hbm_to_vmem [thread:$0]  (!%p1462_p5), %s214_s5, 32, %s216_s0, %s1466_s8  }
  0x42   : > { %s230_s23 = scalar_lea.hbm %s1904_s3, %s1091_s14  ;;  %s226_s17 = scalar_lea.vmem [#allocation8], %s1090_s13 }
  0x43   : > { %s234_s22 = sshll.u32 %s226_s17, 4  ;;  %s232_s25 = sshll.u32 %s230_s23, 4  ;;  %s235_s22 = int_to_ptr.vmem [resolvable:$true] %s234_s22  ;;  %s233_s25 = int_to_ptr.hbm [resolvable:$true] %s232_s25 }
  0x44   : > { %s223_s1 = scalar_lea.sflag [#allocation9], %s1453_s24  ;;  %s1275_s19 = sshra.s32 %s233_s25, 4  ;;  %s1276_s19 = int_to_ptr.hbm [resolvable:$true] %s1275_s19 }
  0x45   : > { %s1277_s27 = scalar_lea.hbm %s1276_s19, 2  ;;  %s1282_s8 = scalar_lea.hbm %s1904_s3, 8 }
  0x46   : > { %p1278_p1 = scmp.ne.s32.totalorder %s1276_s19, %s1277_s27  ;;  %p1283_p6 = scmp.lt.s32.totalorder %s1276_s19, %s1904_s3 }
  0x47   : > { %p1284_p11 = scmp.lt.s32.totalorder %s1282_s8, %s1277_s27 }
  0x48   : > { %p1280_p3 = pnand %p1278_p1, %p1189_p7 }
  0x49   : > { %p1285_p0 = por %p1284_p11, %p1283_p6 }
  0x4a   : > { %p1281_p4 = pneg %p1280_p3 }
  0x4c   : > { %p1286_p13 = pnand %p1285_p0, %p1281_p4 }
  0x4e   : > { %1289 = shalt.err (!%p1286_p13)
}
  0x4f   : > { %1131 = dma.hbm_to_vmem [thread:$0]  (!%p1462_p5), %s233_s25, 32, %s235_s22, %s223_s1  }
  0x50   : > { %243 = sbr.rel (%p1512_p12) target bundleno = 453 (0x1c5), region = 36 }
  0x55   : > { %1350 = dma.done.wait (%p66_p2), [#allocation3], 3584  }
  0x56   : > { %1352 = vsyncadd (%p66_p2), [#allocation3], 4294963712  ;;  %s250_s24 = sand.u32 1, %s1483_s26   ;;  %s1560_s13 = sand.u32 1, %s1371_s16  }
  0x57   : > { %s1096_s11 = sshll.u32 %s1560_s13, 10  ;;  %s251_s20 = scalar_lea.sflag [#allocation6], %s250_s24 }
  0x58   : > { %s1563_s7 = scalar_lea.vmem [#allocation5], %s1096_s11 }
  0x59   : > { %1354 = dma.done.wait (%p1493_p8), %s251_s20, 16416  }
  0x5a   : > { %1356 = vsyncadd (%p1493_p8), %s251_s20, 4294950880  ;;  %s1097_s10 = sshll.u32 %s1560_s13, 1  ;;  %s271_s9 = scalar_lea.sflag [#allocation9], %s1560_s13 }
  0x5b   : > { %s1570_s21 = scalar_lea.vmem [#allocation7], %s1097_s10  ;;  %s1573_s12 = scalar_lea.vmem [#allocation8], %s1097_s10 }
  0x5c   : > { %1358 = dma.done.wait (%p1493_p8), %s271_s9, 32  }
  0x5d   : > { %1360 = vsyncadd (%p1493_p8), %s271_s9, 4294967264  ;;  %v436_v0 = vld [vmem:[%s1563_s7 + $0x2f0] sm:$0xff]  ;;  %v434_v1 = vld [vmem:[%s1563_s7 + $0x2e0] sm:$0xff]  ;;  %vm779_vm0 = vcmask 1040384   ;;  %s1105_s28 = smul.u32 112, %s1560_s13  ;;  %s1104_s17 = sshll.u32 %s1483_s26, 4 }
  0x5e   : > { %v468_v2 = vld [vmem:[%s1563_s7 + $0x3f0] sm:$0xff]  ;;  %546 = vmatpush.msra.mxu2 %v436_v0  ;;  %v466_v6 = vld [vmem:[%s1563_s7 + $0x3e0] sm:$0xff]  ;;  %v1643_v63 = vld [vmem:[#allocation2 + $0x18] sm:$0xff]  ;;  %s951_s1 = scalar_lea.hbm %s1905_s4, %s1104_s17  ;;  %s940_s27 = scalar_lea.sflag [#allocation4], %s1560_s13 }
  0x5f   : > { %584 = vmatpush.msra.mxu3 %v468_v2  ;;  %v372_v3 = vld [vmem:[%s1563_s7 + $0xf0] sm:$0xff]  ;;  %v370_v7 = vld [vmem:[%s1563_s7 + $0xe0] sm:$0xff]  ;;  %v437_v0 = vld [vmem:[%s1563_s7 + $0x2f8] sm:$0xff]  ;;  %s1846_s23 = scalar_lea.vmem [#allocation10], %s1105_s28  ;;  %s954_s19 = sshll.u32 %s951_s1, 4  ;;  %s955_s19 = int_to_ptr.hbm [resolvable:$true] %s954_s19 }
  0x60   : > { %v404_v4 = vld [vmem:[%s1563_s7 + $0x1f0] sm:$0xff]  ;;  %470 = vmatpush.msra.mxu0 %v372_v3  ;;  %v402_v8 = vld [vmem:[%s1563_s7 + $0x1e0] sm:$0xff]  ;;  %547 = vmatpush.msra.mxu2 %v434_v1  ;;  %v469_v1 = vld [vmem:[%s1563_s7 + $0x3f8] sm:$0xff]  ;;  %s952_s26 = sshll.u32 %s1846_s23, 4  ;;  %s1319_s6 = sshra.s32 %s955_s19, 4  ;;  %s953_s26 = int_to_ptr.vmem [resolvable:$true] %s952_s26  ;;  %s1320_s6 = int_to_ptr.hbm [resolvable:$true] %s1319_s6 }
  0x61   : > { %v432_v5 = vld [vmem:[%s1563_s7 + $0x2d0] sm:$0xff]  ;;  %508 = vmatpush.msra.mxu1 %v404_v4  ;;  %585 = vmatpush.msra.mxu3 %v466_v6  ;;  %v430_v11 = vld [vmem:[%s1563_s7 + $0x2c0] sm:$0xff]  ;;  %v373_v6 = vld [vmem:[%s1563_s7 + $0xf8] sm:$0xff]  ;;  %s1321_s0 = scalar_lea.hbm %s1320_s6, 112  ;;  %s1325_s14 = scalar_lea.hbm %s1905_s4, 448 }
  0x62   : > { %v464_v9 = vld [vmem:[%s1563_s7 + $0x3d0] sm:$0xff]  ;;  %471 = vmatpush.msra.mxu0 %v370_v7  ;;  %v462_v13 = vld [vmem:[%s1563_s7 + $0x3c0] sm:$0xff]  ;;  %548 = vmatpush.msra.mxu2 %v432_v5  ;;  %v1653_v5 = vld [vmem:[#allocation2 + $0x8] sm:$0xff]  ;;  %p1322_p5 = scmp.ne.s32.totalorder %s1320_s6, %s1321_s0  ;;  %p1326_p8 = scmp.lt.s32.totalorder %s1320_s6, %s1905_s4 }
  0x63   : > { %v368_v10 = vld [vmem:[%s1563_s7 + $0xd0] sm:$0xff]  ;;  %509 = vmatpush.msra.mxu1 %v402_v8  ;;  %586 = vmatpush.msra.mxu3 %v464_v9  ;;  %v366_v14 = vld [vmem:[%s1563_s7 + $0xc0] sm:$0xff]  ;;  %v405_v7 = vld [vmem:[%s1563_s7 + $0x1f8] sm:$0xff]  ;;  %p1327_p12 = scmp.lt.s32.totalorder %s1325_s14, %s1321_s0 }
  0x64   : > { %v400_v12 = vld [vmem:[%s1563_s7 + $0x1d0] sm:$0xff]  ;;  %v398_v15 = vld [vmem:[%s1563_s7 + $0x1c0] sm:$0xff]  ;;  %472 = vmatpush.msra.mxu0 %v368_v10  ;;  %549 = vmatpush.msra.mxu2 %v430_v11  ;;  %v435_v8 = vld [vmem:[%s1563_s7 + $0x2e8] sm:$0xff]  ;;  %p1323_p7 = pnand %p1322_p5, %p1500_p9 }
  0x65   : > { %510 = vmatpush.msra.mxu1 %v400_v12  ;;  %v428_v16 = vld [vmem:[%s1563_s7 + $0x2b0] sm:$0xff]  ;;  %587 = vmatpush.msra.mxu3 %v462_v13  ;;  %v426_v20 = vld [vmem:[%s1563_s7 + $0x2a0] sm:$0xff]  ;;  %v467_v9 = vld [vmem:[%s1563_s7 + $0x3e8] sm:$0xff]  ;;  %p1328_p1 = por %p1327_p12, %p1326_p8 }
  0x66   : > { %v460_v17 = vld [vmem:[%s1563_s7 + $0x3b0] sm:$0xff]  ;;  %473 = vmatpush.msra.mxu0 %v366_v14  ;;  %v458_v21 = vld [vmem:[%s1563_s7 + $0x3a0] sm:$0xff]  ;;  %550 = vmatpush.msra.mxu2 %v428_v16  ;;  %v371_v10 = vld [vmem:[%s1563_s7 + $0xe8] sm:$0xff]  ;;  %p1324_p2 = pneg %p1323_p7 }
  0x67   : > { %v364_v18 = vld [vmem:[%s1563_s7 + $0xb0] sm:$0xff]  ;;  %511 = vmatpush.msra.mxu1 %v398_v15  ;;  %588 = vmatpush.msra.mxu3 %v460_v17  ;;  %v362_v22 = vld [vmem:[%s1563_s7 + $0xa0] sm:$0xff]  ;;  %v403_v11 = vld [vmem:[%s1563_s7 + $0x1e8] sm:$0xff] }
  0x68   : > { %v396_v19 = vld [vmem:[%s1563_s7 + $0x1b0] sm:$0xff]  ;;  %v394_v23 = vld [vmem:[%s1563_s7 + $0x1a0] sm:$0xff]  ;;  %474 = vmatpush.msra.mxu0 %v364_v18  ;;  %551 = vmatpush.msra.mxu2 %v426_v20  ;;  %v433_v12 = vld [vmem:[%s1563_s7 + $0x2d8] sm:$0xff]  ;;  %p1329_p3 = pnand %p1328_p1, %p1324_p2 }
  0x69   : > { %512 = vmatpush.msra.mxu1 %v396_v19  ;;  %v424_v24 = vld [vmem:[%s1563_s7 + $0x290] sm:$0xff]  ;;  %589 = vmatpush.msra.mxu3 %v458_v21  ;;  %v422_v28 = vld [vmem:[%s1563_s7 + $0x280] sm:$0xff]  ;;  %v465_v13 = vld [vmem:[%s1563_s7 + $0x3d8] sm:$0xff] }
  0x6a   : > { %v456_v25 = vld [vmem:[%s1563_s7 + $0x390] sm:$0xff]  ;;  %475 = vmatpush.msra.mxu0 %v362_v22  ;;  %v454_v29 = vld [vmem:[%s1563_s7 + $0x380] sm:$0xff]  ;;  %552 = vmatpush.msra.mxu2 %v424_v24  ;;  %v1667_v15 = vld [vmem:[#allocation2 + $0x38] sm:$0xff] }
  0x6b   : > { %v360_v26 = vld [vmem:[%s1563_s7 + $0x90] sm:$0xff]  ;;  %513 = vmatpush.msra.mxu1 %v394_v23  ;;  %590 = vmatpush.msra.mxu3 %v456_v25  ;;  %v358_v30 = vld [vmem:[%s1563_s7 + $0x80] sm:$0xff]  ;;  %v369_v16 = vld [vmem:[%s1563_s7 + $0xd8] sm:$0xff] }
  0x6c   : > { %v392_v27 = vld [vmem:[%s1563_s7 + $0x190] sm:$0xff]  ;;  %v390_v31 = vld [vmem:[%s1563_s7 + $0x180] sm:$0xff]  ;;  %476 = vmatpush.msra.mxu0 %v360_v26  ;;  %553 = vmatpush.msra.mxu2 %v422_v28  ;;  %v401_v17 = vld [vmem:[%s1563_s7 + $0x1d8] sm:$0xff] }
  0x6d   : > { %514 = vmatpush.msra.mxu1 %v392_v27  ;;  %v420_v32 = vld [vmem:[%s1563_s7 + $0x270] sm:$0xff]  ;;  %591 = vmatpush.msra.mxu3 %v454_v29  ;;  %v418_v36 = vld [vmem:[%s1563_s7 + $0x260] sm:$0xff]  ;;  %v431_v18 = vld [vmem:[%s1563_s7 + $0x2c8] sm:$0xff] }
  0x6e   : > { %v452_v33 = vld [vmem:[%s1563_s7 + $0x370] sm:$0xff]  ;;  %477 = vmatpush.msra.mxu0 %v358_v30  ;;  %v450_v37 = vld [vmem:[%s1563_s7 + $0x360] sm:$0xff]  ;;  %554 = vmatpush.msra.mxu2 %v420_v32  ;;  %v463_v19 = vld [vmem:[%s1563_s7 + $0x3c8] sm:$0xff] }
  0x6f   : > { %v356_v34 = vld [vmem:[%s1563_s7 + $0x70] sm:$0xff]  ;;  %515 = vmatpush.msra.mxu1 %v390_v31  ;;  %592 = vmatpush.msra.mxu3 %v452_v33  ;;  %v354_v38 = vld [vmem:[%s1563_s7 + $0x60] sm:$0xff]  ;;  %v1677_v21 = vld [vmem:[#allocation2 + $0x28] sm:$0xff] }
  0x70   : > { %v388_v35 = vld [vmem:[%s1563_s7 + $0x170] sm:$0xff]  ;;  %v386_v39 = vld [vmem:[%s1563_s7 + $0x160] sm:$0xff]  ;;  %478 = vmatpush.msra.mxu0 %v356_v34  ;;  %555 = vmatpush.msra.mxu2 %v418_v36  ;;  %v429_v22 = vld [vmem:[%s1563_s7 + $0x2b8] sm:$0xff] }
  0x71   : > { %516 = vmatpush.msra.mxu1 %v388_v35  ;;  %v416_v40 = vld [vmem:[%s1563_s7 + $0x250] sm:$0xff]  ;;  %593 = vmatpush.msra.mxu3 %v450_v37  ;;  %v414_v44 = vld [vmem:[%s1563_s7 + $0x240] sm:$0xff]  ;;  %v367_v23 = vld [vmem:[%s1563_s7 + $0xc8] sm:$0xff] }
  0x72   : > { %v448_v41 = vld [vmem:[%s1563_s7 + $0x350] sm:$0xff]  ;;  %479 = vmatpush.msra.mxu0 %v354_v38  ;;  %v446_v45 = vld [vmem:[%s1563_s7 + $0x340] sm:$0xff]  ;;  %556 = vmatpush.msra.mxu2 %v416_v40  ;;  %v399_v24 = vld [vmem:[%s1563_s7 + $0x1c8] sm:$0xff] }
  0x73   : > { %v352_v42 = vld [vmem:[%s1563_s7 + $0x50] sm:$0xff]  ;;  %517 = vmatpush.msra.mxu1 %v386_v39  ;;  %594 = vmatpush.msra.mxu3 %v448_v41  ;;  %v350_v46 = vld [vmem:[%s1563_s7 + $0x40] sm:$0xff]  ;;  %v461_v25 = vld [vmem:[%s1563_s7 + $0x3b8] sm:$0xff] }
  0x74   : > { %v384_v43 = vld [vmem:[%s1563_s7 + $0x150] sm:$0xff]  ;;  %v382_v47 = vld [vmem:[%s1563_s7 + $0x140] sm:$0xff]  ;;  %480 = vmatpush.msra.mxu0 %v352_v42  ;;  %557 = vmatpush.msra.mxu2 %v414_v44  ;;  %v365_v26 = vld [vmem:[%s1563_s7 + $0xb8] sm:$0xff] }
  0x75   : > { %518 = vmatpush.msra.mxu1 %v384_v43  ;;  %v412_v48 = vld [vmem:[%s1563_s7 + $0x230] sm:$0xff]  ;;  %595 = vmatpush.msra.mxu3 %v446_v45  ;;  %v410_v52 = vld [vmem:[%s1563_s7 + $0x220] sm:$0xff]  ;;  %v427_v27 = vld [vmem:[%s1563_s7 + $0x2a8] sm:$0xff] }
  0x76   : > { %v444_v49 = vld [vmem:[%s1563_s7 + $0x330] sm:$0xff]  ;;  %481 = vmatpush.msra.mxu0 %v350_v46  ;;  %v442_v53 = vld [vmem:[%s1563_s7 + $0x320] sm:$0xff]  ;;  %558 = vmatpush.msra.mxu2 %v412_v48  ;;  %v397_v28 = vld [vmem:[%s1563_s7 + $0x1b8] sm:$0xff] }
  0x77   : > { %v348_v50 = vld [vmem:[%s1563_s7 + $0x30] sm:$0xff]  ;;  %519 = vmatpush.msra.mxu1 %v382_v47  ;;  %596 = vmatpush.msra.mxu3 %v444_v49  ;;  %v346_v54 = vld [vmem:[%s1563_s7 + $0x20] sm:$0xff]  ;;  %v459_v29 = vld [vmem:[%s1563_s7 + $0x3a8] sm:$0xff] }
  0x78   : > { %v380_v51 = vld [vmem:[%s1563_s7 + $0x130] sm:$0xff]  ;;  %v378_v55 = vld [vmem:[%s1563_s7 + $0x120] sm:$0xff]  ;;  %482 = vmatpush.msra.mxu0 %v348_v50  ;;  %559 = vmatpush.msra.mxu2 %v410_v52  ;;  %v1691_v31 = vld [vmem:[#allocation2 + $0x58] sm:$0xff] }
  0x79   : > { %520 = vmatpush.msra.mxu1 %v380_v51  ;;  %v408_v56 = vld [vmem:[%s1563_s7 + $0x210] sm:$0xff]  ;;  %597 = vmatpush.msra.mxu3 %v442_v53  ;;  %v406_v60 = vld [vmem:[%s1563_s7 + $0x200] sm:$0xff]  ;;  %v425_v32 = vld [vmem:[%s1563_s7 + $0x298] sm:$0xff] }
  0x7a   : > { %v440_v57 = vld [vmem:[%s1563_s7 + $0x310] sm:$0xff]  ;;  %483 = vmatpush.msra.mxu0 %v346_v54  ;;  %v438_v61 = vld [vmem:[%s1563_s7 + $0x300] sm:$0xff]  ;;  %560 = vmatpush.msra.mxu2 %v408_v56  ;;  %v363_v33 = vld [vmem:[%s1563_s7 + $0xa8] sm:$0xff] }
  0x7b   : > { %v344_v58 = vld [vmem:[%s1563_s7 + $0x10] sm:$0xff]  ;;  %521 = vmatpush.msra.mxu1 %v378_v55  ;;  %598 = vmatpush.msra.mxu3 %v440_v57  ;;  %v342_v2 = vld [vmem:[%s1563_s7] sm:$0xff]  ;;  %v395_v34 = vld [vmem:[%s1563_s7 + $0x1a8] sm:$0xff] }
  0x7c   : > { %v376_v59 = vld [vmem:[%s1563_s7 + $0x110] sm:$0xff]  ;;  %484 = vmatpush.msra.mxu0 %v344_v58  ;;  %561 = vmatpush.msra.mxu2 %v406_v60  ;;  %v374_v3 = vld [vmem:[%s1563_s7 + $0x100] sm:$0xff]  ;;  %v457_v35 = vld [vmem:[%s1563_s7 + $0x398] sm:$0xff] }
  0x7d   : > { %v1641_v62 = vld [vmem:[#allocation2 + $0x10] sm:$0xff]  ;;  %522 = vmatpush.msra.mxu1 %v376_v59  ;;  %599 = vmatpush.msra.mxu3 %v438_v61  ;;  %v1651_v4 = vld [vmem:[#allocation2] sm:$0xff]  ;;  %v1701_v37 = vld [vmem:[#allocation2 + $0x48] sm:$0xff] }
  0x7e   : > { %562 = vmatmul.f32.vlgmr.msra.gmra.mxu2 %v1641_v62  ;;  %600 = vmatmul.f32.vlgmr.msra.gmra.mxu3 %v1643_v63  ;;  %v1665_v14 = vld [vmem:[#allocation2 + $0x30] sm:$0xff]  ;;  %v1675_v20 = vld [vmem:[#allocation2 + $0x20] sm:$0xff]  ;;  %v361_v38 = vld [vmem:[%s1563_s7 + $0x98] sm:$0xff] }
  0x7f   : > { %698 = vmatpush.msrb.mxu2 %v437_v0  ;;  %736 = vmatpush.msrb.mxu3 %v469_v1  ;;  %v1689_v30 = vld [vmem:[#allocation2 + $0x50] sm:$0xff]  ;;  %v1699_v36 = vld [vmem:[#allocation2 + $0x40] sm:$0xff]  ;;  %v393_v39 = vld [vmem:[%s1563_s7 + $0x198] sm:$0xff] }
  0x80   : > { %485 = vmatpush.msra.mxu0 %v342_v2  ;;  %523 = vmatpush.msra.mxu1 %v374_v3  ;;  %v423_v40 = vld [vmem:[%s1563_s7 + $0x288] sm:$0xff]  ;;  %v421_v44 = vld [vmem:[%s1563_s7 + $0x278] sm:$0xff]  ;;  %v1713_v46 = vld [vmem:[#allocation2 + $0x70] sm:$0xff] }
  0x81   : > { %486 = vmatmul.f32.vlgmr.msra.gmra.mxu0 %v1651_v4  ;;  %524 = vmatmul.f32.vlgmr.msra.gmra.mxu1 %v1653_v5  ;;  %v455_v41 = vld [vmem:[%s1563_s7 + $0x388] sm:$0xff]  ;;  %v453_v45 = vld [vmem:[%s1563_s7 + $0x378] sm:$0xff]  ;;  %v1723_v52 = vld [vmem:[#allocation2 + $0x60] sm:$0xff] }
  0x82   : > { %622 = vmatpush.msrb.mxu0 %v373_v6  ;;  %660 = vmatpush.msrb.mxu1 %v405_v7  ;;  %v359_v42 = vld [vmem:[%s1563_s7 + $0x88] sm:$0xff]  ;;  %v1715_v47 = vld [vmem:[#allocation2 + $0x78] sm:$0xff]  ;;  %v1737_v0 = vld [vmem:[#allocation2 + $0x90] sm:$0xff] }
  0x83   : > { %699 = vmatpush.msrb.mxu2 %v435_v8  ;;  %737 = vmatpush.msrb.mxu3 %v467_v9  ;;  %v391_v43 = vld [vmem:[%s1563_s7 + $0x188] sm:$0xff]  ;;  %v357_v48 = vld [vmem:[%s1563_s7 + $0x78] sm:$0xff]  ;;  %v1747_v8 = vld [vmem:[#allocation2 + $0x80] sm:$0xff] }
  0x84   : > { %623 = vmatpush.msrb.mxu0 %v371_v10  ;;  %661 = vmatpush.msrb.mxu1 %v403_v11  ;;  %v389_v49 = vld [vmem:[%s1563_s7 + $0x178] sm:$0xff]  ;;  %v419_v50 = vld [vmem:[%s1563_s7 + $0x268] sm:$0xff] }
  0x85   : > { %700 = vmatpush.msrb.mxu2 %v433_v12  ;;  %738 = vmatpush.msrb.mxu3 %v465_v13  ;;  %v451_v51 = vld [vmem:[%s1563_s7 + $0x368] sm:$0xff]  ;;  %v417_v54 = vld [vmem:[%s1563_s7 + $0x258] sm:$0xff] }
  0x86   : > { %565 = vmatmul.f32.gmra.mxu2 %v1665_v14  ;;  %603 = vmatmul.f32.gmra.mxu3 %v1667_v15  ;;  %v1725_v53 = vld [vmem:[#allocation2 + $0x68] sm:$0xff]  ;;  %v449_v57 = vld [vmem:[%s1563_s7 + $0x358] sm:$0xff] }
  0x87   : > { %624 = vmatpush.msrb.mxu0 %v369_v16  ;;  %662 = vmatpush.msrb.mxu1 %v401_v17  ;;  %v355_v55 = vld [vmem:[%s1563_s7 + $0x68] sm:$0xff]  ;;  %v353_v58 = vld [vmem:[%s1563_s7 + $0x58] sm:$0xff] }
  0x88   : > { %701 = vmatpush.msrb.mxu2 %v431_v18  ;;  %739 = vmatpush.msrb.mxu3 %v463_v19  ;;  %v387_v56 = vld [vmem:[%s1563_s7 + $0x168] sm:$0xff]  ;;  %v385_v60 = vld [vmem:[%s1563_s7 + $0x158] sm:$0xff] }
  0x89   : > { %489 = vmatmul.f32.gmra.mxu0 %v1675_v20  ;;  %527 = vmatmul.f32.gmra.mxu1 %v1677_v21  ;;  %v415_v59 = vld [vmem:[%s1563_s7 + $0x248] sm:$0xff]  ;;  %v1739_v1 = vld [vmem:[#allocation2 + $0x98] sm:$0xff] }
  0x8a   : > { %702 = vmatpush.msrb.mxu2 %v429_v22  ;;  %625 = vmatpush.msrb.mxu0 %v367_v23  ;;  %v447_v61 = vld [vmem:[%s1563_s7 + $0x348] sm:$0xff]  ;;  %v413_v2 = vld [vmem:[%s1563_s7 + $0x238] sm:$0xff]  ;;  %v336_v22 = vld [vmem:[#allocation2 + $0xb0] sm:$0xff] }
  0x8b   : > { %663 = vmatpush.msrb.mxu1 %v399_v24  ;;  %740 = vmatpush.msrb.mxu3 %v461_v25  ;;  %v351_v3 = vld [vmem:[%s1563_s7 + $0x48] sm:$0xff]  ;;  %v445_v7 = vld [vmem:[%s1563_s7 + $0x338] sm:$0xff] }
  0x8c   : > { %626 = vmatpush.msrb.mxu0 %v365_v26  ;;  %703 = vmatpush.msrb.mxu2 %v427_v27  ;;  %v383_v6 = vld [vmem:[%s1563_s7 + $0x148] sm:$0xff]  ;;  %v349_v10 = vld [vmem:[%s1563_s7 + $0x38] sm:$0xff] }
  0x8d   : > { %664 = vmatpush.msrb.mxu1 %v397_v28  ;;  %741 = vmatpush.msrb.mxu3 %v459_v29  ;;  %v1749_v9 = vld [vmem:[#allocation2 + $0x88] sm:$0xff]  ;;  %v381_v11 = vld [vmem:[%s1563_s7 + $0x138] sm:$0xff]  ;;  %v334_v28 = vld [vmem:[#allocation2 + $0xa0] sm:$0xff] }
  0x8e   : > { %568 = vmatmul.f32.gmra.mxu2 %v1689_v30  ;;  %606 = vmatmul.f32.gmra.mxu3 %v1691_v31  ;;  %v411_v12 = vld [vmem:[%s1563_s7 + $0x228] sm:$0xff]  ;;  %v409_v18 = vld [vmem:[%s1563_s7 + $0x218] sm:$0xff] }
  0x8f   : > { %704 = vmatpush.msrb.mxu2 %v425_v32  ;;  %627 = vmatpush.msrb.mxu0 %v363_v33  ;;  %v443_v13 = vld [vmem:[%s1563_s7 + $0x328] sm:$0xff]  ;;  %v441_v19 = vld [vmem:[%s1563_s7 + $0x318] sm:$0xff] }
  0x90   : > { %665 = vmatpush.msrb.mxu1 %v395_v34  ;;  %742 = vmatpush.msrb.mxu3 %v457_v35  ;;  %v347_v16 = vld [vmem:[%s1563_s7 + $0x28] sm:$0xff]  ;;  %v337_v23 = vld [vmem:[#allocation2 + $0xb8] sm:$0xff]  ;;  %v340_v34 = vld [vmem:[#allocation2 + $0xd0] sm:$0x1] }
  0x91   : > { %492 = vmatmul.f32.gmra.mxu0 %v1699_v36  ;;  %530 = vmatmul.f32.gmra.mxu1 %v1701_v37  ;;  %v379_v17 = vld [vmem:[%s1563_s7 + $0x128] sm:$0xff]  ;;  %v345_v24 = vld [vmem:[%s1563_s7 + $0x18] sm:$0xff] }
  0x92   : > { %628 = vmatpush.msrb.mxu0 %v361_v38  ;;  %666 = vmatpush.msrb.mxu1 %v393_v39  ;;  %v377_v25 = vld [vmem:[%s1563_s7 + $0x118] sm:$0xff]  ;;  %v407_v26 = vld [vmem:[%s1563_s7 + $0x208] sm:$0xff]  ;;  %v338_v38 = vld [vmem:[#allocation2 + $0xc0] sm:$0x1] }
  0x93   : > { %705 = vmatpush.msrb.mxu2 %v423_v40  ;;  %743 = vmatpush.msrb.mxu3 %v455_v41  ;;  %v439_v27 = vld [vmem:[%s1563_s7 + $0x308] sm:$0xff]  ;;  %v341_v35 = vld [vmem:[#allocation2 + $0xd8] sm:$0x1] }
  0x94   : > { %629 = vmatpush.msrb.mxu0 %v359_v42  ;;  %667 = vmatpush.msrb.mxu1 %v391_v43  ;;  %v335_v29 = vld [vmem:[#allocation2 + $0xa8] sm:$0xff] }
  0x95   : > { %706 = vmatpush.msrb.mxu2 %v421_v44  ;;  %744 = vmatpush.msrb.mxu3 %v453_v45  ;;  %v343_v32 = vld [vmem:[%s1563_s7 + $0x8] sm:$0xff] }
  0x96   : > { %571 = vmatmul.f32.gmra.mxu2 %v1713_v46  ;;  %609 = vmatmul.f32.gmra.mxu3 %v1715_v47  ;;  %v375_v33 = vld [vmem:[%s1563_s7 + $0x108] sm:$0xff] }
  0x97   : > { %630 = vmatpush.msrb.mxu0 %v357_v48  ;;  %668 = vmatpush.msrb.mxu1 %v389_v49  ;;  %v339_v39 = vld [vmem:[#allocation2 + $0xc8] sm:$0x1] }
  0x98   : > { %707 = vmatpush.msrb.mxu2 %v419_v50  ;;  %745 = vmatpush.msrb.mxu3 %v451_v51 }
  0x99   : > { %495 = vmatmul.f32.gmra.mxu0 %v1723_v52  ;;  %533 = vmatmul.f32.gmra.mxu1 %v1725_v53 }
  0x9a   : > { %708 = vmatpush.msrb.mxu2 %v417_v54  ;;  %631 = vmatpush.msrb.mxu0 %v355_v55 }
  0x9b   : > { %669 = vmatpush.msrb.mxu1 %v387_v56  ;;  %746 = vmatpush.msrb.mxu3 %v449_v57 }
  0x9c   : > { %632 = vmatpush.msrb.mxu0 %v353_v58  ;;  %709 = vmatpush.msrb.mxu2 %v415_v59 }
  0x9d   : > { %670 = vmatpush.msrb.mxu1 %v385_v60  ;;  %747 = vmatpush.msrb.mxu3 %v447_v61 }
  0x9e   : > { %574 = vmatmul.f32.gmra.mxu2 %v1737_v0  ;;  %612 = vmatmul.f32.gmra.mxu3 %v1739_v1 }
  0x9f   : > { %710 = vmatpush.msrb.mxu2 %v413_v2  ;;  %633 = vmatpush.msrb.mxu0 %v351_v3 }
  0xa0   : > { %671 = vmatpush.msrb.mxu1 %v383_v6  ;;  %748 = vmatpush.msrb.mxu3 %v445_v7 }
  0xa1   : > { %498 = vmatmul.f32.gmra.mxu0 %v1747_v8  ;;  %536 = vmatmul.f32.gmra.mxu1 %v1749_v9 }
  0xa2   : > { %634 = vmatpush.msrb.mxu0 %v349_v10  ;;  %672 = vmatpush.msrb.mxu1 %v381_v11 }
  0xa3   : > { %711 = vmatpush.msrb.mxu2 %v411_v12  ;;  %749 = vmatpush.msrb.mxu3 %v443_v13 }
  0xa4   : > { %635 = vmatpush.msrb.mxu0 %v347_v16  ;;  %673 = vmatpush.msrb.mxu1 %v379_v17 }
  0xa5   : > { %712 = vmatpush.msrb.mxu2 %v409_v18  ;;  %750 = vmatpush.msrb.mxu3 %v441_v19 }
  0xa6   : > { %577 = vmatmul.f32.gmra.mxu2 %v336_v22  ;;  %615 = vmatmul.f32.gmra.mxu3 %v337_v23 }
  0xa7   : > { %636 = vmatpush.msrb.mxu0 %v345_v24  ;;  %674 = vmatpush.msrb.mxu1 %v377_v25 }
  0xa8   : > { %713 = vmatpush.msrb.mxu2 %v407_v26  ;;  %751 = vmatpush.msrb.mxu3 %v439_v27 }
  0xa9   : > { %501 = vmatmul.f32.gmra.mxu0 %v334_v28  ;;  %539 = vmatmul.f32.gmra.mxu1 %v335_v29 }
  0xaa   : > { %637 = vmatpush.msrb.mxu0 %v343_v32  ;;  %675 = vmatpush.msrb.mxu1 %v375_v33 }
  0xae   : > { %580 = vmatmul.f32.gmra.mxu2 %v340_v34  ;;  %618 = vmatmul.f32.gmra.mxu3 %v341_v35 }
  0xb1   : > { %504 = vmatmul.f32.gmra.mxu0 %v338_v38  ;;  %542 = vmatmul.f32.gmra.mxu1 %v339_v39 }
  0xb6   : > { %714 = vmatmul.f32.vlgmr.msrb.gmra.mxu2 %v1641_v62  ;;  %752 = vmatmul.f32.vlgmr.msrb.gmra.mxu3 %v1643_v63 }
  0xb9   : > { %638 = vmatmul.f32.vlgmr.msrb.gmra.mxu0 %v1651_v4  ;;  %676 = vmatmul.f32.vlgmr.msrb.gmra.mxu1 %v1653_v5 }
  0xbe   : > { %717 = vmatmul.f32.gmra.mxu2 %v1665_v14  ;;  %755 = vmatmul.f32.gmra.mxu3 %v1667_v15 }
  0xc1   : > { %641 = vmatmul.f32.gmra.mxu0 %v1675_v20  ;;  %679 = vmatmul.f32.gmra.mxu1 %v1677_v21 }
  0xc6   : > { %720 = vmatmul.f32.gmra.mxu2 %v1689_v30  ;;  %758 = vmatmul.f32.gmra.mxu3 %v1691_v31 }
  0xc9   : > { %644 = vmatmul.f32.gmra.mxu0 %v1699_v36  ;;  %682 = vmatmul.f32.gmra.mxu1 %v1701_v37 }
  0xce   : > { %723 = vmatmul.f32.gmra.mxu2 %v1713_v46  ;;  %761 = vmatmul.f32.gmra.mxu3 %v1715_v47 }
  0xd1   : > { %647 = vmatmul.f32.gmra.mxu0 %v1723_v52  ;;  %685 = vmatmul.f32.gmra.mxu1 %v1725_v53 }
  0xd6   : > { %726 = vmatmul.f32.gmra.mxu2 %v1737_v0  ;;  %764 = vmatmul.f32.gmra.mxu3 %v1739_v1 }
  0xd9   : > { %650 = vmatmul.f32.gmra.mxu0 %v1747_v8  ;;  %688 = vmatmul.f32.gmra.mxu1 %v1749_v9 }
  0xde   : > { %729 = vmatmul.f32.gmra.mxu2 %v336_v22  ;;  %767 = vmatmul.f32.gmra.mxu3 %v337_v23 }
  0xe1   : > { %653 = vmatmul.f32.gmra.mxu0 %v334_v28  ;;  %691 = vmatmul.f32.gmra.mxu1 %v335_v29 }
  0xe6   : > { %732 = vmatmul.f32.gmra.mxu2 %v340_v34  ;;  %770 = vmatmul.f32.gmra.mxu3 %v341_v35 }
  0xe9   : > { %656 = vmatmul.f32.gmra.mxu0 %v338_v38  ;;  %694 = vmatmul.f32.gmra.mxu1 %v339_v39 }
  0xfe   : > { %v487_v62 = vpop.f32.mrf.mxu0  ;;  %v525_v63 = vpop.f32.mrf.mxu1 }
  0xff   : > { %v526_v49 = vadd.f32 %v525_v63, %v487_v62 }
 0x101   : > { %v563_v4 = vpop.f32.mrf.mxu2  ;;  %v601_v5 = vpop.f32.mrf.mxu3 }
 0x102   : > { %v564_v55 = vadd.f32 %v563_v4, %v526_v49 }
 0x104   : > { %v602_v1 = vadd.f32 %v601_v5, %v564_v55 }
 0x106   : > { %v490_v14 = vpop.f32.mrf.mxu0  ;;  %v528_v15 = vpop.f32.mrf.mxu1 }
 0x107   : > { %v529_v46 = vadd.f32 %v528_v15, %v490_v14 }
 0x109   : > { %v566_v20 = vpop.f32.mrf.mxu2  ;;  %v604_v21 = vpop.f32.mrf.mxu3 }
 0x10a   : > { %v567_v51 = vadd.f32 %v566_v20, %v529_v46 }
 0x10c   : > { %v605_v58 = vadd.f32 %v604_v21, %v567_v51 }
 0x10e   : > { %v493_v30 = vpop.f32.mrf.mxu0  ;;  %v531_v31 = vpop.f32.mrf.mxu1  ;;  %v774_v6 = vadd.f32 %v605_v58, %v602_v1 }
 0x10f   : > { %v532_v50 = vadd.f32 %v531_v31, %v493_v30 }
 0x111   : > { %v569_v36 = vpop.f32.mrf.mxu2  ;;  %v607_v37 = vpop.f32.mrf.mxu3 }
 0x112   : > { %v570_v56 = vadd.f32 %v569_v36, %v532_v50 }
 0x114   : > { %v608_v2 = vadd.f32 %v607_v37, %v570_v56 }
 0x116   : > { %v496_v40 = vpop.f32.mrf.mxu0  ;;  %v534_v41 = vpop.f32.mrf.mxu1  ;;  %v775_v11 = vadd.f32 %v774_v6, %v608_v2 }
 0x117   : > { %v535_v52 = vadd.f32 %v534_v41, %v496_v40 }
 0x119   : > { %v572_v42 = vpop.f32.mrf.mxu2  ;;  %v610_v43 = vpop.f32.mrf.mxu3 }
 0x11a   : > { %v573_v59 = vadd.f32 %v572_v42, %v535_v52 }
 0x11c   : > { %v611_v7 = vadd.f32 %v610_v43, %v573_v59 }
 0x11e   : > { %v499_v44 = vpop.f32.mrf.mxu0  ;;  %v537_v45 = vpop.f32.mrf.mxu1  ;;  %v776_v16 = vadd.f32 %v775_v11, %v611_v7 }
 0x11f   : > { %v538_v57 = vadd.f32 %v537_v45, %v499_v44 }
 0x121   : > { %v575_v47 = vpop.f32.mrf.mxu2  ;;  %v613_v48 = vpop.f32.mrf.mxu3 }
 0x122   : > { %v576_v3 = vadd.f32 %v575_v47, %v538_v57 }
 0x124   : > { %v614_v12 = vadd.f32 %v613_v48, %v576_v3 }
 0x126   : > { %v502_v53 = vpop.f32.mrf.mxu0  ;;  %v540_v54 = vpop.f32.mrf.mxu1  ;;  %v777_v23 = vadd.f32 %v776_v16, %v614_v12 }
 0x127   : > { %v541_v60 = vadd.f32 %v540_v54, %v502_v53 }
 0x129   : > { %v578_v61 = vpop.f32.mrf.mxu2  ;;  %v616_v0 = vpop.f32.mrf.mxu3 }
 0x12a   : > { %v579_v8 = vadd.f32 %v578_v61, %v541_v60 }
 0x12c   : > { %v617_v17 = vadd.f32 %v616_v0, %v579_v8 }
 0x12e   : > { %v505_v9 = vpop.f32.mrf.mxu0  ;;  %v543_v10 = vpop.f32.mrf.mxu1  ;;  %v778_v25 = vadd.f32 %v777_v23, %v617_v17 }
 0x12f   : > { %v544_v13 = vadd.f32 %v543_v10, %v505_v9 }
 0x131   : > { %v581_v18 = vpop.f32.mrf.mxu2  ;;  %v619_v19 = vpop.f32.mrf.mxu3 }
 0x132   : > { %v582_v22 = vadd.f32 %v581_v18, %v544_v13 }
 0x134   : > { %v620_v24 = vadd.f32 %v619_v19, %v582_v22 }
 0x136   : > { %v780_v26 = vsel %vm779_vm0, %v620_v24, 0.0  ;;  %v639_v27 = vpop.f32.mrf.mxu0  ;;  %v677_v28 = vpop.f32.mrf.mxu1 }
 0x137   : > { %v781_v29 = vadd.f32 %v780_v26, %v778_v25 }
 0x139   : > { %v782_v32 = vrot.slane %v781_v29, 4  ;;  %v715_v33 = vpop.f32.mrf.mxu2  ;;  %v1788_v34 = vpop.f32.mrf.mxu3 }
 0x13b   : > { %v783_v35 = vadd.f32 %v782_v32, %v781_v29 }
 0x13d   : > { %v784_v38 = vrot.slane %v783_v35, 2 }
 0x13e   : > { %v642_v39 = vpop.f32.mrf.mxu0  ;;  %v680_v62 = vpop.f32.mrf.mxu1 }
 0x13f   : > { %v785_v63 = vadd.f32 %v784_v38, %v783_v35  ;;  %v681_v8 = vadd.f32 %v680_v62, %v642_v39 }
 0x141   : > { %v786_v4 = vrot.slane %v785_v63, 1  ;;  %v718_v5 = vpop.f32.mrf.mxu2  ;;  %v756_v14 = vpop.f32.mrf.mxu3 }
 0x143   : > { %v787_v15 = vadd.f32 %v786_v4, %v785_v63 }
 0x145   : > { %v801_v20 = vmul.f32 0.020408163, %v787_v15 }
 0x146   : > { %v645_v21 = vpop.f32.mrf.mxu0  ;;  %v683_v30 = vpop.f32.mrf.mxu1 }
 0x147   : > { %v1790_v31 = vsub.f32 %v602_v1, %v801_v20  ;;  %v1792_v36 = vsub.f32 %v605_v58, %v801_v20  ;;  %v1794_v37 = vsub.f32 %v608_v2, %v801_v20  ;;  %v1796_v40 = vsub.f32 %v611_v7, %v801_v20 }
 0x148   : > { %v1802_v45 = vsub.f32 %v614_v12, %v801_v20  ;;  %v1806_v48 = vsub.f32 %v620_v24, %v801_v20  ;;  %v1808_v49 = vsub.f32 %v617_v17, %v801_v20  ;;  %v678_v12 = vadd.f32 %v677_v28, %v639_v27 }
 0x149   : > { %v817_v41 = vmul.f32 %v1790_v31, %v1790_v31  ;;  %v819_v42 = vmul.f32 %v1792_v36, %v1792_v36  ;;  %v721_v43 = vpop.f32.mrf.mxu2  ;;  %v759_v44 = vpop.f32.mrf.mxu3  ;;  %v821_v46 = vmul.f32 %v1794_v37, %v1794_v37  ;;  %v823_v50 = vmul.f32 %v1796_v40, %v1796_v40 }
 0x14a   : > { %v825_v54 = vmul.f32 %v1802_v45, %v1802_v45  ;;  %v829_v56 = vmul.f32 %v1806_v48, %v1806_v48  ;;  %v827_v57 = vmul.f32 %v1808_v49, %v1808_v49  ;;  %v684_v13 = vadd.f32 %v683_v30, %v645_v21 }
 0x14b   : > { %v831_v47 = vadd.f32 %v819_v42, %v817_v41  ;;  %v719_v17 = vadd.f32 %v718_v5, %v681_v8  ;;  %v716_v24 = vadd.f32 %v715_v33, %v678_v12  ;;  %v1835_v8 = vld [vmem:[%s1573_s12] sm:$0x3] }
 0x14c   : > { %v836_v0 = vsel %vm779_vm0, %v829_v56, 0.0  ;;  %v722_v25 = vadd.f32 %v721_v43, %v684_v13  ;;  %v907_v12 = vperm.slane %v1835_v8, 0 }
 0x14d   : > { %v832_v51 = vadd.f32 %v831_v47, %v821_v46  ;;  %v1819_v32 = vadd.f32 %v756_v14, %v719_v17  ;;  %v754_v27 = vadd.f32 %v1788_v34, %v716_v24 }
 0x14e   : > { %v648_v52 = vpop.f32.mrf.mxu0  ;;  %v686_v53 = vpop.f32.mrf.mxu1  ;;  %v760_v28 = vadd.f32 %v759_v44, %v722_v25 }
 0x14f   : > { %v833_v55 = vadd.f32 %v832_v51, %v823_v50  ;;  %v687_v18 = vadd.f32 %v686_v53, %v648_v52  ;;  %v788_v15 = vadd.f32 %v1819_v32, %v754_v27 }
 0x151   : > { %v834_v58 = vadd.f32 %v833_v55, %v825_v54  ;;  %v724_v59 = vpop.f32.mrf.mxu2  ;;  %v762_v60 = vpop.f32.mrf.mxu3  ;;  %v789_v14 = vadd.f32 %v788_v15, %v760_v28 }
 0x152   : > { %v725_v35 = vadd.f32 %v724_v59, %v687_v18 }
 0x153   : > { %v835_v61 = vadd.f32 %v834_v58, %v827_v57 }
 0x154   : > { %v1823_v20 = vadd.f32 %v762_v60, %v725_v35  ;;  %v1831_v60 = vld [vmem:[%s1570_s21] sm:$0x3] }
 0x155   : > { %v837_v1 = vadd.f32 %v836_v0, %v835_v61 }
 0x156   : > { %v651_v2 = vpop.f32.mrf.mxu0  ;;  %v689_v3 = vpop.f32.mrf.mxu1  ;;  %v790_v43 = vadd.f32 %v789_v14, %v1823_v20 }
 0x157   : > { %v838_v6 = vrot.slane %v837_v1, 4  ;;  %v690_v26 = vadd.f32 %v689_v3, %v651_v2 }
 0x159   : > { %v839_v7 = vadd.f32 %v838_v6, %v837_v1  ;;  %v727_v9 = vpop.f32.mrf.mxu2  ;;  %v765_v10 = vpop.f32.mrf.mxu3  ;;  %v883_v1 = vperm.slane %v1831_v60, 0 }
 0x15a   : > { %v728_v4 = vadd.f32 %v727_v9, %v690_v26 }
 0x15b   : > { %v840_v11 = vrot.slane %v839_v7, 2 }
 0x15c   : > { %v766_v41 = vadd.f32 %v765_v10, %v728_v4 }
 0x15d   : > { %v841_v16 = vadd.f32 %v840_v11, %v839_v7 }
 0x15e   : > { %v654_v19 = vpop.f32.mrf.mxu0  ;;  %v692_v22 = vpop.f32.mrf.mxu1  ;;  %v791_v50 = vadd.f32 %v790_v43, %v766_v41 }
 0x15f   : > { %v842_v23 = vrot.slane %v841_v16, 1  ;;  %v693_v38 = vadd.f32 %v692_v22, %v654_v19 }
 0x161   : > { %v843_v29 = vadd.f32 %v842_v23, %v841_v16  ;;  %v730_v39 = vpop.f32.mrf.mxu2  ;;  %v768_v62 = vpop.f32.mrf.mxu3 }
 0x162   : > { %v731_v33 = vadd.f32 %v730_v39, %v693_v38 }
 0x163   : > { %v857_v63 = vmul.f32 0.020408163, %v843_v29 }
 0x164   : > { %v1826_v46 = vadd.f32 %v768_v62, %v731_v33 }
 0x165   : > { %v859_v5 = vadd.f32 1e-05, %v857_v63 }
 0x166   : > { %v657_v21 = vpop.f32.mrf.mxu0  ;;  %v695_v30 = vpop.f32.mrf.mxu1  ;;  %v792_v53 = vadd.f32 %v791_v50, %v1826_v46 }
 0x167   : > { %1181 = vrsqrt.f32 %v859_v5  ;;  %v696_v42 = vadd.f32 %v695_v30, %v657_v21  ;;  %vm867_vm2 = vweird.f32 %v859_v5 }
 0x169   : > { %v733_v34 = vpop.f32.mrf.mxu2  ;;  %v771_v44 = vpop.f32.mrf.mxu3 }
 0x16a   : > { %v734_v47 = vadd.f32 %v733_v34, %v696_v42 }
 0x16c   : > { %v772_v51 = vadd.f32 %v771_v44, %v734_v47 }
 0x16d   : > { %v1182_v52 = vpop.eup %1181 }
 0x16e   : > { %v862_v54 = vmul.f32 %v1182_v52, %v859_v5  ;;  %v793_v55 = vsel %vm779_vm0, %v772_v51, 0.0  ;;  %vm868_vm1 = vweird.f32 %v1182_v52 }
 0x16f   : > { %v794_v56 = vadd.f32 %v793_v55, %v792_v53  ;;  %vm869_vm3 = vmor %vm867_vm2, %vm868_vm1 }
 0x170   : > { %v863_v57 = vmul.f32 %v1182_v52, %v862_v54 }
 0x171   : > { %v795_v58 = vrot.slane %v794_v56, 4 }
 0x172   : > { %v864_v59 = vmul.f32 0.5, %v863_v57 }
 0x173   : > { %v796_v61 = vadd.f32 %v795_v58, %v794_v56 }
 0x174   : > { %v865_v0 = vsub.f32 1.5, %v864_v59  ;;  %v884_v59 = vperm.slane %v1831_v60, 1 }
 0x175   : > { %v797_v2 = vrot.slane %v796_v61, 2 }
 0x176   : > { %v866_v3 = vmul.f32 %v1182_v52, %v865_v0 }
 0x177   : > { %v798_v6 = vadd.f32 %v797_v2, %v796_v61 }
 0x178   : > { %v870_v7 = vsel %vm869_vm3, %v1182_v52, %v866_v3  ;;  %v908_v3 = vperm.slane %v1835_v8, 1 }
 0x179   : > { %v887_v9 = vmul.f32 %v883_v1, %v870_v7  ;;  %v799_v10 = vrot.slane %v798_v6, 1 }
 0x17b   : > { %v889_v11 = vperm.slane %v887_v9, 0  ;;  %v800_v13 = vadd.f32 %v799_v10, %v798_v6 }
 0x17d   : > { %v891_v16 = vmul.f32 %v889_v11, %v1790_v31  ;;  %v893_v17 = vmul.f32 %v889_v11, %v1792_v36  ;;  %v895_v18 = vmul.f32 %v889_v11, %v1794_v37  ;;  %v897_v19 = vmul.f32 %v889_v11, %v1796_v40 }
 0x17e   : > { %v899_v22 = vmul.f32 %v889_v11, %v1802_v45  ;;  %v901_v23 = vmul.f32 %v889_v11, %v1808_v49  ;;  %v802_v24 = vmul.f32 0.020408163, %v800_v13  ;;  %v903_v25 = vmul.f32 %v889_v11, %v1806_v48 }
 0x17f   : > { %v911_v26 = vadd.f32 %v907_v12, %v891_v16  ;;  %v913_v29 = vadd.f32 %v907_v12, %v893_v17  ;;  %v915_v35 = vadd.f32 %v907_v12, %v895_v18  ;;  %v917_v38 = vadd.f32 %v907_v12, %v897_v19 }
 0x180   : > { %v804_v39 = vsub.f32 %v754_v27, %v802_v24  ;;  %v919_v62 = vadd.f32 %v907_v12, %v899_v22  ;;  %v806_v31 = vsub.f32 %v1819_v32, %v802_v24  ;;  %v808_v36 = vsub.f32 %v760_v28, %v802_v24 }
 0x181   : > { %925 = vst [vmem:[%s1846_s23] sm:$0xff] %v911_v26  ;;  %v921_v37 = vadd.f32 %v907_v12, %v901_v23  ;;  %v923_v45 = vadd.f32 %v907_v12, %v903_v25  ;;  %v810_v48 = vsub.f32 %v1823_v20, %v802_v24  ;;  %v812_v63 = vsub.f32 %v766_v41, %v802_v24 }
 0x182   : > { %927 = vst [vmem:[%s1846_s23 + $0x10] sm:$0xff] %v913_v29  ;;  %v818_v40 = vmul.f32 %v804_v39, %v804_v39  ;;  %v820_v49 = vmul.f32 %v806_v31, %v806_v31  ;;  %v822_v27 = vmul.f32 %v808_v36, %v808_v36  ;;  %v816_v5 = vsub.f32 %v772_v51, %v802_v24 }
 0x183   : > { %929 = vst [vmem:[%s1846_s23 + $0x20] sm:$0xff] %v915_v35  ;;  %v814_v32 = vsub.f32 %v1826_v46, %v802_v24  ;;  %v824_v15 = vmul.f32 %v810_v48, %v810_v48  ;;  %v826_v33 = vmul.f32 %v812_v63, %v812_v63 }
 0x184   : > { %931 = vst [vmem:[%s1846_s23 + $0x30] sm:$0xff] %v917_v38  ;;  %v844_v4 = vadd.f32 %v820_v49, %v818_v40  ;;  %v830_v30 = vmul.f32 %v816_v5, %v816_v5 }
 0x185   : > { %933 = vst [vmem:[%s1846_s23 + $0x40] sm:$0xff] %v919_v62  ;;  %v828_v14 = vmul.f32 %v814_v32, %v814_v32 }
 0x186   : > { %935 = vst [vmem:[%s1846_s23 + $0x50] sm:$0xff] %v921_v37  ;;  %v845_v28 = vadd.f32 %v844_v4, %v822_v27  ;;  %v849_v20 = vsel %vm779_vm0, %v830_v30, 0.0 }
 0x187   : > { %937 = vst [vmem:[%s1846_s23 + $0x60] sm:$0x1] %v923_v45 }
 0x188   : > { %v846_v21 = vadd.f32 %v845_v28, %v824_v15 }
 0x18a   : > { %v847_v42 = vadd.f32 %v846_v21, %v826_v33 }
 0x18c   : > { %v848_v43 = vadd.f32 %v847_v42, %v828_v14 }
 0x18e   : > { %v850_v34 = vadd.f32 %v849_v20, %v848_v43 }
 0x190   : > { %v851_v44 = vrot.slane %v850_v34, 4 }
 0x192   : > { %v852_v41 = vadd.f32 %v851_v44, %v850_v34 }
 0x194   : > { %v853_v47 = vrot.slane %v852_v41, 2 }
 0x196   : > { %v854_v50 = vadd.f32 %v853_v47, %v852_v41 }
 0x198   : > { %v855_v52 = vrot.slane %v854_v50, 1 }
 0x19a   : > { %v856_v51 = vadd.f32 %v855_v52, %v854_v50 }
 0x19c   : > { %v858_v53 = vmul.f32 0.020408163, %v856_v51 }
 0x19e   : > { %v860_v54 = vadd.f32 1e-05, %v858_v53 }
 0x1a0   : > { %1183 = vrsqrt.f32 %v860_v54  ;;  %vm877_vm5 = vweird.f32 %v860_v54 }
 0x1a6   : > { %v1184_v46 = vpop.eup %1183 }
 0x1a7   : > { %v872_v55 = vmul.f32 %v1184_v46, %v860_v54  ;;  %vm878_vm4 = vweird.f32 %v1184_v46 }
 0x1a8   : > { %vm879_vm6 = vmor %vm877_vm5, %vm878_vm4 }
 0x1a9   : > { %v873_v56 = vmul.f32 %v1184_v46, %v872_v55 }
 0x1ab   : > { %v874_v57 = vmul.f32 0.5, %v873_v56 }
 0x1ad   : > { %v875_v58 = vsub.f32 1.5, %v874_v57 }
 0x1af   : > { %v876_v61 = vmul.f32 %v1184_v46, %v875_v58 }
 0x1b1   : > { %v880_v0 = vsel %vm879_vm6, %v1184_v46, %v876_v61 }
 0x1b2   : > { %v888_v1 = vmul.f32 %v884_v59, %v880_v0 }
 0x1b4   : > { %v890_v2 = vperm.slane %v888_v1, 0 }
 0x1b6   : > { %v892_v6 = vmul.f32 %v890_v2, %v804_v39  ;;  %v894_v7 = vmul.f32 %v890_v2, %v806_v31  ;;  %v896_v9 = vmul.f32 %v890_v2, %v808_v36  ;;  %v898_v10 = vmul.f32 %v890_v2, %v810_v48 }
 0x1b7   : > { %v900_v11 = vmul.f32 %v890_v2, %v812_v63  ;;  %v902_v12 = vmul.f32 %v890_v2, %v814_v32  ;;  %v904_v60 = vmul.f32 %v890_v2, %v816_v5 }
 0x1b8   : > { %v912_v13 = vadd.f32 %v908_v3, %v892_v6  ;;  %v914_v8 = vadd.f32 %v908_v3, %v894_v7  ;;  %v916_v16 = vadd.f32 %v908_v3, %v896_v9  ;;  %v918_v17 = vadd.f32 %v908_v3, %v898_v10 }
 0x1b9   : > { %v920_v18 = vadd.f32 %v908_v3, %v900_v11  ;;  %v922_v19 = vadd.f32 %v908_v3, %v902_v12  ;;  %v924_v22 = vadd.f32 %v908_v3, %v904_v60 }
 0x1ba   : > { %926 = vst [vmem:[%s1846_s23 + $0x8] sm:$0xff] %v912_v13 }
 0x1bb   : > { %928 = vst [vmem:[%s1846_s23 + $0x18] sm:$0xff] %v914_v8 }
 0x1bc   : > { %930 = vst [vmem:[%s1846_s23 + $0x28] sm:$0xff] %v916_v16 }
 0x1bd   : > { %932 = vst [vmem:[%s1846_s23 + $0x38] sm:$0xff] %v918_v17 }
 0x1be   : > { %934 = vst [vmem:[%s1846_s23 + $0x48] sm:$0xff] %v920_v18 }
 0x1bf   : > { %936 = vst [vmem:[%s1846_s23 + $0x58] sm:$0xff] %v922_v19 }
 0x1c0   : > { %938 = vst [vmem:[%s1846_s23 + $0x68] sm:$0x1] %v924_v22 }
 0x1c1   : > { %1332 = shalt.err (!%p1329_p3)
}
 0x1c2   : > { %s1387_s13 = smov 256   ;;  %s1388_s20 = smov 1024  }
 0x1c3   : > { %s1389_s7 = smov 16  }
 0x1c4   : > { %1116 = dma.vmem_to_hbm [thread:$0]  (%p1500_p9), %s953_s26, 1792, %s955_s19, %s940_s27, %s1387_s13, %s1388_s20, %s1389_s7  }
 0x1c5 PF: > { %p1139_p4 = scmp.ge.s32.totalorder %s1379_s18, 2  ;;  %s969_s10 = sand.u32 1, %s1367_s15  }
 0x1c6   : > { %s970_s21 = scalar_lea.sflag [#allocation4], %s969_s10 }
 0x1c7   : > { %p1133_p6 = pnand %p1139_p4, %p1504_p10 }
 0x1c9   : > { %p1134_p11 = pneg %p1133_p6 }
 0x1cb   : > { %1362 = dma.done.wait (%p1134_p11), %s970_s21, 1792  }
 0x1cc   : > { %1364 = vsyncadd (%p1134_p11), %s970_s21, 4294965504  ;;  %s1921_s18 = sld [smem:[#allocation16_spill]]  ;;  %s1924_s15 = smov %s1371_s16 }
 0x1cd   : > { %s1922_s9 = sld [smem:[#allocation15_spill]] }
 0x1ce   : > { %s1923_s17 = sld [smem:[#allocation17_spill]] }
 0x1d2   : > { %p21_p0 = scmp.ge.s32.totalorder %s1921_s18, 6  }
 0x1d3   : > { %s1925_s16 = smov %s1922_s9 }
 0x1d4   :  { %23 = sbr.rel (!%p21_p0) target bundleno = 11 (0xb), region = 110 }
 0x1d9   :  { %976 = vsyncpa [#allocation3], 1 }
 0x1da   :  { %978 = vsyncpa [#allocation3 + $0x1], 1 }
 0x1db   :  { %979 = vsyncpa [#allocation6], 1 }
 0x1dc   :  { %981 = vsyncpa [#allocation6 + $0x1], 1 }
 0x1dd   :  { %982 = vsyncpa [#allocation9], 1 }
 0x1de   :  { %984 = vsyncpa [#allocation9 + $0x1], 1 }
 0x1df   :  { %985 = vsyncpa [#allocation4], 1 }
 0x1e0   :  { %987 = vsyncpa [#allocation4 + $0x1], 1 }

</bundles_post_ra>
